<compile_context>
chip_gen: v6e
topology: v6e:2x2x1
jax: 0.10.0
libtpu: 0.0.40
codegen_flags: <defaults>
</compile_context>

<pallas_src>
import numpy as np
import jax
import jax.numpy as jnp
from jax import lax
from jax.experimental import pallas as pl
from jax.experimental.pallas import tpu as pltpu


def _round_up(x, m):
    return ((x + m - 1) // m) * m


def trend_block_kernel(x_ref,
                       w1_ref, b1_ref, w2_ref, b2_ref,
                       w3_ref, b3_ref, w4_ref, b4_ref,
                       we_ref, be_ref,
                       out_ref):
    """Fused forward. x_ref is (tile_m, L) natural layout; everything downstream is
    lane-dense (feature, tile_m)."""
    # fc1 with the input transpose folded into the MXU contraction:
    #   W1 (units, L) . x (tile_m, L)^T -> (units, tile_m)
    h = lax.dot_general(w1_ref[...], x_ref[...], (((1,), (1,)), ((), ())),
                        preferred_element_type=jnp.float32) + b1_ref[...]
    h = jnp.maximum(h, 0.0)

    def dense_relu(w_ref, b_ref, h):
        # W: (out, in), h: (in, tile_m), b: (out, 1) broadcast along lanes.
        return jnp.maximum(
            jnp.dot(w_ref[...], h, preferred_element_type=jnp.float32) + b_ref[...],
            0.0)

    h = dense_relu(w2_ref, b2_ref, h)      # fc2 + relu (d2 identity in eval)
    h = dense_relu(w3_ref, b3_ref, h)      # fc3 + relu (d3 identity in eval)
    h = dense_relu(w4_ref, b4_ref, h)      # fc4 + relu
    # Fused shared-theta + basis projection: out = (T_cat^T @ Wt) @ h + T_cat^T @ bt.
    out_ref[...] = (jnp.dot(we_ref[...], h, preferred_element_type=jnp.float32)
                    + be_ref[...])


def trend_block_forward(x, params, t_b_mat, t_f_mat, *, tile_m_target=8192):
    """x: (B, C, backcast_len) float32. Returns (backcast, forecast)."""
    B, C, L = x.shape
    M = B * C
    (w1, b1, w2, b2, w3, b3, w4, b4, wt, bt) = params
    units = w1.shape[0]
    backcast_len = t_b_mat.shape[1]
    forecast_len = t_f_mat.shape[1]
    out_len = backcast_len + forecast_len
    assert L == backcast_len

    # Fuse theta_fc with both basis projections (rank-p composition; fp-reorder only).
    t_cat = jnp.concatenate([t_b_mat, t_f_mat], axis=1)        # (p, out_len)
    w_eff = jnp.dot(t_cat.T, wt)                               # (out_len, units)
    b_eff = jnp.dot(t_cat.T, bt)                               # (out_len, 1)

    # Tiling over M: pad only to a multiple of 128, choose large tiles, and keep the
    # grid >= 2 steps whenever M allows it (both v7x TensorCores get work).
    M_128 = _round_up(M, 128)
    n_tiles = max(pl.cdiv(M_128, tile_m_target), min(2, M_128 // 128))
    tile_m = _round_up(pl.cdiv(M_128, n_tiles), 128)
    M_pad = n_tiles * tile_m
    grid = (n_tiles,)

    x2 = x.reshape(M, L)
    if M_pad != M:
        x2 = jnp.pad(x2, ((0, M_pad - M), (0, 0)))             # (M_pad, L)

    row_in = lambda i: (i, 0)      # tile the (M_pad, L) input along M (sublane axis)
    row_out = lambda i: (0, i)     # tile the (out_len, M_pad) output along M (lane axis)
    rep = lambda i: (0, 0)         # weights / biases replicated across the grid

    in_specs = [
        pl.BlockSpec((tile_m, L), row_in),
        pl.BlockSpec(w1.shape, rep), pl.BlockSpec(b1.shape, rep),
        pl.BlockSpec(w2.shape, rep), pl.BlockSpec(b2.shape, rep),
        pl.BlockSpec(w3.shape, rep), pl.BlockSpec(b3.shape, rep),
        pl.BlockSpec(w4.shape, rep), pl.BlockSpec(b4.shape, rep),
        pl.BlockSpec(w_eff.shape, rep), pl.BlockSpec(b_eff.shape, rep),
    ]
    out_specs = pl.BlockSpec((out_len, tile_m), row_out)
    out_shape = jax.ShapeDtypeStruct((out_len, M_pad), jnp.float32)

    # VMEM budget: input block lane-pads to 128 (2x double-buffered), output block
    # sublane-pads to a multiple of 8 (2x), plus a few live f32 activation slabs.
    vmem_est = tile_m * (2 * 128 * 4 + 2 * _round_up(out_len, 8) * 4 + 3 * units * 4)
    vmem_limit = int(min(max(2 * vmem_est, 32 << 20), 48 << 20))

    # Cost hint so XLA can schedule/overlap this small custom call sensibly.
    flops = 2 * M_pad * (L * units + 3 * units * units + units * out_len)
    param_bytes = 4 * sum(int(np.prod(a.shape)) for a in
                          (w1, b1, w2, b2, w3, b3, w4, b4, w_eff, b_eff))
    bytes_accessed = 4 * M_pad * (L + out_len) + param_bytes

    out = pl.pallas_call(
        trend_block_kernel,
        grid=grid,
        in_specs=in_specs,
        out_specs=out_specs,
        out_shape=out_shape,
        compiler_params=pltpu.CompilerParams(
            dimension_semantics=("parallel",),
            vmem_limit_bytes=vmem_limit),
        cost_estimate=pl.CostEstimate(flops=flops, transcendentals=0,
                                      bytes_accessed=bytes_accessed),
    )(x2, w1, b1, w2, b2, w3, b3, w4, b4, w_eff, b_eff)

    # Slice rows first, then transpose each slab exactly once.
    backcast = jnp.transpose(out[:backcast_len, :M]).reshape(B, C, backcast_len)
    forecast = jnp.transpose(out[backcast_len:, :M]).reshape(B, C, forecast_len)
    return backcast, forecast


def _torch_linear_init(key, fan_in, fan_out):
    """Deterministic stand-in for nn.Linear default init: U(-1/sqrt(fan_in), 1/sqrt(fan_in)).
    Weight kept in native PyTorch (fan_out, fan_in) layout; bias as a (fan_out, 1) column."""
    k = 1.0 / np.sqrt(fan_in)
    kw, kb = jax.random.split(key)
    w = jax.random.uniform(kw, (fan_out, fan_in), jnp.float32, minval=-k, maxval=k)
    b = jax.random.uniform(kb, (fan_out, 1), jnp.float32, minval=-k, maxval=k)
    return w, b


def make_params(key, backcast_length, units, thetas_dim):
    keys = jax.random.split(key, 5)
    w1, b1 = _torch_linear_init(keys[0], backcast_length, units)
    w2, b2 = _torch_linear_init(keys[1], units, units)
    w3, b3 = _torch_linear_init(keys[2], units, units)
    w4, b4 = _torch_linear_init(keys[3], units, units)
    wt, bt = _torch_linear_init(keys[4], units, thetas_dim)   # shared theta_b_fc == theta_f_fc
    return (w1, b1, w2, b2, w3, b3, w4, b4, wt, bt)


def make_trend_basis(backcast_length, forecast_length, thetas_dim):
    assert thetas_dim <= 4, "thetas_dim is too big."
    lin = np.linspace(-backcast_length, forecast_length, backcast_length + forecast_length)
    b_ls = lin[:backcast_length]
    f_ls = lin[backcast_length:]
    t_b = np.stack([b_ls ** i for i in range(thetas_dim)]).astype(np.float32)  # (p, backcast)
    t_f = np.stack([f_ls ** i for i in range(thetas_dim)]).astype(np.float32)  # (p, forecast)
    return jnp.asarray(t_b), jnp.asarray(t_f)


def reference_forward(x, params, t_b_mat, t_f_mat):
    (w1, b1, w2, b2, w3, b3, w4, b4, wt, bt) = params
    B, C, L = x.shape
    h = x.reshape(B * C, L)
    h = jax.nn.relu(h @ w1.T + b1.T)
    h = jax.nn.relu(h @ w2.T + b2.T)
    h = jax.nn.relu(h @ w3.T + b3.T)
    h = jax.nn.relu(h @ w4.T + b4.T)
    theta = h @ wt.T + bt.T
    back = (theta @ t_b_mat).reshape(B, C, -1)
    fore = (theta @ t_f_mat).reshape(B, C, -1)
    return back, fore


if __name__ == "__main__":
    # Small shapes consistent with the module defaults:
    #   backcast_length=10, forecast_length=5, units=32, thetas_dim=4, B=2, C=4.
    B, C = 2, 4
    backcast_length, forecast_length = 10, 5
    units, thetas_dim = 32, 4

    key = jax.random.PRNGKey(0)
    k_x, k_p = jax.random.split(key)
    x = jax.random.normal(k_x, (B, C, backcast_length), dtype=jnp.float32)

    params = make_params(k_p, backcast_length, units, thetas_dim)
    t_b_mat, t_f_mat = make_trend_basis(backcast_length, forecast_length, thetas_dim)

    backcast, forecast = trend_block_forward(x, params, t_b_mat, t_f_mat)
    backcast = jax.block_until_ready(backcast)
    forecast = jax.block_until_ready(forecast)

    ref_back, ref_fore = reference_forward(x, params, t_b_mat, t_f_mat)
    assert backcast.shape == (B, C, backcast_length)
    assert forecast.shape == (B, C, forecast_length)
    np.testing.assert_allclose(np.asarray(backcast), np.asarray(ref_back), rtol=1e-4, atol=1e-4)
    np.testing.assert_allclose(np.asarray(forecast), np.asarray(ref_fore), rtol=1e-4, atol=1e-4)

    print("KERNEL_OK")
</pallas_src>

<mosaic_0001>
module attributes {stable_mosaic.version = 11 : i64} {
  func.func @trend_block_kernel(%arg0: i32, %arg1: memref<128x10xf32, #tpu.memory_space<vmem>>, %arg2: memref<32x10xf32, #tpu.memory_space<vmem>>, %arg3: memref<32x1xf32, #tpu.memory_space<vmem>>, %arg4: memref<32x32xf32, #tpu.memory_space<vmem>>, %arg5: memref<32x1xf32, #tpu.memory_space<vmem>>, %arg6: memref<32x32xf32, #tpu.memory_space<vmem>>, %arg7: memref<32x1xf32, #tpu.memory_space<vmem>>, %arg8: memref<32x32xf32, #tpu.memory_space<vmem>>, %arg9: memref<32x1xf32, #tpu.memory_space<vmem>>, %arg10: memref<15x32xf32, #tpu.memory_space<vmem>>, %arg11: memref<15x1xf32, #tpu.memory_space<vmem>>, %arg12: memref<15x128xf32, #tpu.memory_space<vmem>>) attributes {dimension_semantics = [#tpu.dimension_semantics<parallel>], iteration_bounds = array<i64: 1>, scalar_prefetch = 0 : i64, scratch_operands = 0 : i64, tpu.core_type = #tpu.core_type<tc>, window_params = [{transform_indices = @transform_0, window_bounds = array<i64: 128, 10>}, {pipeline_mode = #tpu.pipeline_mode<synchronous>, transform_indices = @transform_1, window_bounds = array<i64: 32, 10>}, {pipeline_mode = #tpu.pipeline_mode<synchronous>, transform_indices = @transform_2, window_bounds = array<i64: 32, 1>}, {pipeline_mode = #tpu.pipeline_mode<synchronous>, transform_indices = @transform_3, window_bounds = array<i64: 32, 32>}, {pipeline_mode = #tpu.pipeline_mode<synchronous>, transform_indices = @transform_4, window_bounds = array<i64: 32, 1>}, {pipeline_mode = #tpu.pipeline_mode<synchronous>, transform_indices = @transform_5, window_bounds = array<i64: 32, 32>}, {pipeline_mode = #tpu.pipeline_mode<synchronous>, transform_indices = @transform_6, window_bounds = array<i64: 32, 1>}, {pipeline_mode = #tpu.pipeline_mode<synchronous>, transform_indices = @transform_7, window_bounds = array<i64: 32, 32>}, {pipeline_mode = #tpu.pipeline_mode<synchronous>, transform_indices = @transform_8, window_bounds = array<i64: 32, 1>}, {pipeline_mode = #tpu.pipeline_mode<synchronous>, transform_indices = @transform_9, window_bounds = array<i64: 15, 32>}, {pipeline_mode = #tpu.pipeline_mode<synchronous>, transform_indices = @transform_10, window_bounds = array<i64: 15, 1>}, {transform_indices = @transform_11, window_bounds = array<i64: 15, 128>}]} {
    %c0 = arith.constant 0 : index
    %c0_0 = arith.constant 0 : index
    %0 = vector.load %arg2[%c0, %c0_0] : memref<32x10xf32, #tpu.memory_space<vmem>>, vector<32x10xf32>
    %c0_1 = arith.constant 0 : index
    %c0_2 = arith.constant 0 : index
    %1 = vector.load %arg1[%c0_1, %c0_2] : memref<128x10xf32, #tpu.memory_space<vmem>>, vector<128x10xf32>
    %cst = arith.constant dense<0.000000e+00> : vector<32x128xf32>
    %2 = tpu.matmul %0, %1, %cst {dimension_numbers = #tpu.dot_dimension_numbers<[1], [1], [0], [0], [0, 0, 1, 0], [], []>} : vector<32x10xf32>, vector<128x10xf32>, vector<32x128xf32> -> vector<32x128xf32>
    %c0_3 = arith.constant 0 : index
    %c0_4 = arith.constant 0 : index
    %3 = vector.load %arg3[%c0_3, %c0_4] : memref<32x1xf32, #tpu.memory_space<vmem>>, vector<32x1xf32>
    %4 = vector.broadcast %3 : vector<32x1xf32> to vector<32x128xf32>
    %5 = arith.addf %2, %4 : vector<32x128xf32>
    %cst_5 = arith.constant 0.000000e+00 : f32
    %6 = vector.broadcast %cst_5 : f32 to vector<32x128xf32>
    %7 = arith.maximumf %5, %6 : vector<32x128xf32>
    %c0_6 = arith.constant 0 : index
    %c0_7 = arith.constant 0 : index
    %8 = vector.load %arg4[%c0_6, %c0_7] : memref<32x32xf32, #tpu.memory_space<vmem>>, vector<32x32xf32>
    %cst_8 = arith.constant dense<0.000000e+00> : vector<32x128xf32>
    %9 = tpu.matmul %8, %7, %cst_8 {dimension_numbers = #tpu.dot_dimension_numbers<[1], [0], [0], [1], [0, 0, 1, 1], [], []>} : vector<32x32xf32>, vector<32x128xf32>, vector<32x128xf32> -> vector<32x128xf32>
    %c0_9 = arith.constant 0 : index
    %c0_10 = arith.constant 0 : index
    %10 = vector.load %arg5[%c0_9, %c0_10] : memref<32x1xf32, #tpu.memory_space<vmem>>, vector<32x1xf32>
    %11 = vector.broadcast %10 : vector<32x1xf32> to vector<32x128xf32>
    %12 = arith.addf %9, %11 : vector<32x128xf32>
    %cst_11 = arith.constant 0.000000e+00 : f32
    %13 = vector.broadcast %cst_11 : f32 to vector<32x128xf32>
    %14 = arith.maximumf %12, %13 : vector<32x128xf32>
    %c0_12 = arith.constant 0 : index
    %c0_13 = arith.constant 0 : index
    %15 = vector.load %arg6[%c0_12, %c0_13] : memref<32x32xf32, #tpu.memory_space<vmem>>, vector<32x32xf32>
    %cst_14 = arith.constant dense<0.000000e+00> : vector<32x128xf32>
    %16 = tpu.matmul %15, %14, %cst_14 {dimension_numbers = #tpu.dot_dimension_numbers<[1], [0], [0], [1], [0, 0, 1, 1], [], []>} : vector<32x32xf32>, vector<32x128xf32>, vector<32x128xf32> -> vector<32x128xf32>
    %c0_15 = arith.constant 0 : index
    %c0_16 = arith.constant 0 : index
    %17 = vector.load %arg7[%c0_15, %c0_16] : memref<32x1xf32, #tpu.memory_space<vmem>>, vector<32x1xf32>
    %18 = vector.broadcast %17 : vector<32x1xf32> to vector<32x128xf32>
    %19 = arith.addf %16, %18 : vector<32x128xf32>
    %cst_17 = arith.constant 0.000000e+00 : f32
    %20 = vector.broadcast %cst_17 : f32 to vector<32x128xf32>
    %21 = arith.maximumf %19, %20 : vector<32x128xf32>
    %c0_18 = arith.constant 0 : index
    %c0_19 = arith.constant 0 : index
    %22 = vector.load %arg8[%c0_18, %c0_19] : memref<32x32xf32, #tpu.memory_space<vmem>>, vector<32x32xf32>
    %cst_20 = arith.constant dense<0.000000e+00> : vector<32x128xf32>
    %23 = tpu.matmul %22, %21, %cst_20 {dimension_numbers = #tpu.dot_dimension_numbers<[1], [0], [0], [1], [0, 0, 1, 1], [], []>} : vector<32x32xf32>, vector<32x128xf32>, vector<32x128xf32> -> vector<32x128xf32>
    %c0_21 = arith.constant 0 : index
    %c0_22 = arith.constant 0 : index
    %24 = vector.load %arg9[%c0_21, %c0_22] : memref<32x1xf32, #tpu.memory_space<vmem>>, vector<32x1xf32>
    %25 = vector.broadcast %24 : vector<32x1xf32> to vector<32x128xf32>
    %26 = arith.addf %23, %25 : vector<32x128xf32>
    %cst_23 = arith.constant 0.000000e+00 : f32
    %27 = vector.broadcast %cst_23 : f32 to vector<32x128xf32>
    %28 = arith.maximumf %26, %27 : vector<32x128xf32>
    %c0_24 = arith.constant 0 : index
    %c0_25 = arith.constant 0 : index
    %29 = vector.load %arg10[%c0_24, %c0_25] : memref<15x32xf32, #tpu.memory_space<vmem>>, vector<15x32xf32>
    %cst_26 = arith.constant dense<0.000000e+00> : vector<15x128xf32>
    %30 = tpu.matmul %29, %28, %cst_26 {dimension_numbers = #tpu.dot_dimension_numbers<[1], [0], [0], [1], [0, 0, 1, 1], [], []>} : vector<15x32xf32>, vector<32x128xf32>, vector<15x128xf32> -> vector<15x128xf32>
    %c0_27 = arith.constant 0 : index
    %c0_28 = arith.constant 0 : index
    %31 = vector.load %arg11[%c0_27, %c0_28] : memref<15x1xf32, #tpu.memory_space<vmem>>, vector<15x1xf32>
    %32 = vector.broadcast %31 : vector<15x1xf32> to vector<15x128xf32>
    %33 = arith.addf %30, %32 : vector<15x128xf32>
    %c0_29 = arith.constant 0 : index
    %c0_30 = arith.constant 0 : index
    %34 = vector.load %arg12[%c0_29, %c0_30] : memref<15x128xf32, #tpu.memory_space<vmem>>, vector<15x128xf32>
    tpu.vector_store %arg12[%c0_29, %c0_30], %33 {strides = array<i32>} : memref<15x128xf32, #tpu.memory_space<vmem>>, vector<15x128xf32>,
    return
  }
  func.func @transform_0(%arg0: i32) -> (i32, i32) {
    %c0_i32 = arith.constant 0 : i32
    %c0_i32_0 = arith.constant 0 : i32
    return %arg0, %c0_i32 : i32, i32
  }
  func.func @transform_1(%arg0: i32) -> (i32, i32) {
    %c0_i32 = arith.constant 0 : i32
    %c0_i32_0 = arith.constant 0 : i32
    %c0_i32_1 = arith.constant 0 : i32
    return %c0_i32, %c0_i32_0 : i32, i32
  }
  func.func @transform_2(%arg0: i32) -> (i32, i32) {
    %c0_i32 = arith.constant 0 : i32
    %c0_i32_0 = arith.constant 0 : i32
    %c0_i32_1 = arith.constant 0 : i32
    return %c0_i32, %c0_i32_0 : i32, i32
  }
  func.func @transform_3(%arg0: i32) -> (i32, i32) {
    %c0_i32 = arith.constant 0 : i32
    %c0_i32_0 = arith.constant 0 : i32
    %c0_i32_1 = arith.constant 0 : i32
    return %c0_i32, %c0_i32_0 : i32, i32
  }
  func.func @transform_4(%arg0: i32) -> (i32, i32) {
    %c0_i32 = arith.constant 0 : i32
    %c0_i32_0 = arith.constant 0 : i32
    %c0_i32_1 = arith.constant 0 : i32
    return %c0_i32, %c0_i32_0 : i32, i32
  }
  func.func @transform_5(%arg0: i32) -> (i32, i32) {
    %c0_i32 = arith.constant 0 : i32
    %c0_i32_0 = arith.constant 0 : i32
    %c0_i32_1 = arith.constant 0 : i32
    return %c0_i32, %c0_i32_0 : i32, i32
  }
  func.func @transform_6(%arg0: i32) -> (i32, i32) {
    %c0_i32 = arith.constant 0 : i32
    %c0_i32_0 = arith.constant 0 : i32
    %c0_i32_1 = arith.constant 0 : i32
    return %c0_i32, %c0_i32_0 : i32, i32
  }
  func.func @transform_7(%arg0: i32) -> (i32, i32) {
    %c0_i32 = arith.constant 0 : i32
    %c0_i32_0 = arith.constant 0 : i32
    %c0_i32_1 = arith.constant 0 : i32
    return %c0_i32, %c0_i32_0 : i32, i32
  }
  func.func @transform_8(%arg0: i32) -> (i32, i32) {
    %c0_i32 = arith.constant 0 : i32
    %c0_i32_0 = arith.constant 0 : i32
    %c0_i32_1 = arith.constant 0 : i32
    return %c0_i32, %c0_i32_0 : i32, i32
  }
  func.func @transform_9(%arg0: i32) -> (i32, i32) {
    %c0_i32 = arith.constant 0 : i32
    %c0_i32_0 = arith.constant 0 : i32
    %c0_i32_1 = arith.constant 0 : i32
    return %c0_i32, %c0_i32_0 : i32, i32
  }
  func.func @transform_10(%arg0: i32) -> (i32, i32) {
    %c0_i32 = arith.constant 0 : i32
    %c0_i32_0 = arith.constant 0 : i32
    %c0_i32_1 = arith.constant 0 : i32
    return %c0_i32, %c0_i32_0 : i32, i32
  }
  func.func @transform_11(%arg0: i32) -> (i32, i32) {
    %c0_i32 = arith.constant 0 : i32
    %c0_i32_0 = arith.constant 0 : i32
    return %c0_i32, %arg0 : i32, i32
  }
}

</mosaic_0001>

<bundles_post_ra>
// kernel: tpu_custom_call.1
= control target key start
LH: loop header
LB: loop body
LE: loop exit
PB: predicated region body
PF: predicated region fallthrough
CT: control target
= control target key end

     0   :  { %vm83_vm0 = vcmask 80896   ;;  %v937_v2 = vmov 0   ;;  %s1210_s0 = inlined_call_operand.vmem [shape: f32[128,10], index: 0, kind: input, shape index: {}]   ;;  %s1211_s1 = inlined_call_operand.vmem [shape: f32[32,10], index: 1, kind: input, shape index: {}]   ;;  %s1212_s2 = inlined_call_operand.vmem [shape: f32[32,1], index: 2, kind: input, shape index: {}]   ;;  %s1213_s3 = inlined_call_operand.vmem [shape: f32[32,32], index: 3, kind: input, shape index: {}]   ;;  %s1214_s4 = inlined_call_operand.vmem [shape: f32[32,1], index: 4, kind: input, shape index: {}]   ;;  %s1215_s5 = inlined_call_operand.vmem [shape: f32[32,32], index: 5, kind: input, shape index: {}]   ;;  %s1216_s6 = inlined_call_operand.vmem [shape: f32[32,1], index: 6, kind: input, shape index: {}]   ;;  %s1217_s7 = inlined_call_operand.vmem [shape: f32[32,32], index: 7, kind: input, shape index: {}]   ;;  %s1218_s8 = inlined_call_operand.vmem [shape: f32[32,1], index: 8, kind: input, shape index: {}]   ;;  %s1219_s9 = inlined_call_operand.vmem [shape: f32[15,32], index: 9, kind: input, shape index: {}]   ;;  %s1220_s10 = inlined_call_operand.vmem [shape: f32[15,1], index: 10, kind: input, shape index: {}]   ;;  %s1221_s11 = inlined_call_operand.hbm [shape: f32[15,128], index: 11, kind: output, shape index: {}]  }
   0x1   :  { %v58_v0 = vld [vmem:[%s1210_s0 + $0x78] sm:$0xff]  ;;  %v57_v1 = vld [vmem:[%s1210_s0 + $0x70] sm:$0xff]  ;;  %913 = vset.pattern.permute.xlu0 %v937_v2  ;;  %914 = vset.pattern.permute.xlu1 %v937_v2  ;;  %v56_v3 = vld [vmem:[%s1210_s0 + $0x68] sm:$0xff] }
   0x2   :  { %818 = vmatprep.subr.msk.mxu0 %vm83_vm0, %v58_v0  ;;  %v39_v4 = vld [vmem:[%s1211_s1] sm:$0xff]  ;;  %v62_v5 = vld [vmem:[%s1212_s2 + $0x18] sm:$0xff]  ;;  %v60_v6 = vld [vmem:[%s1212_s2 + $0x8] sm:$0xff] }
   0x3   :  { %819 = vmatpush3.xpose.msk.msra.mxu0 %vm83_vm0, %v58_v0  ;;  %850 = vmatprep.mubr.msk.f32.mxu0 %vm83_vm0, %v39_v4  ;;  %v55_v7 = vld [vmem:[%s1210_s0 + $0x60] sm:$0xff]  ;;  %v61_v8 = vld [vmem:[%s1212_s2 + $0x10] sm:$0xff]  ;;  %v54_v10 = vld [vmem:[%s1210_s0 + $0x58] sm:$0xff] }
   0x4   :  { %820 = vmatprep.subr.msk.mxu0 %vm83_vm0, %v57_v1  ;;  %80 = vperm.xlu0 %913, %v62_v5   ;;  %v59_v9 = vld [vmem:[%s1212_s2] sm:$0xff]  ;;  %v240_v11 = vld [vmem:[%s1214_s4 + $0x18] sm:$0xff] }
   0x5   :  { %70 = vperm.xlu1 %914, %v60_v6  }
   0x7   :  { %821 = vmatpush3.xpose.msk.msra.mxu0 %vm83_vm0, %v57_v1 }
   0x8   :  { %822 = vmatprep.subr.msk.mxu0 %vm83_vm0, %v56_v3  ;;  %75 = vperm.xlu0 %913, %v61_v8  }
   0x9   :  { %65 = vperm.xlu1 %914, %v59_v9  }
   0xb   :  { %823 = vmatpush3.xpose.msk.msra.mxu0 %vm83_vm0, %v56_v3 }
   0xc   :  { %824 = vmatprep.subr.msk.mxu0 %vm83_vm0, %v55_v7 }
   0xd   :  { %16 = vsyncpa [#allocation3], 0  ;;  %v239_v12 = vld [vmem:[%s1214_s4 + $0x10] sm:$0xff]  ;;  %258 = vperm.xlu0 %913, %v240_v11   ;;  %v238_v14 = vld [vmem:[%s1214_s4 + $0x8] sm:$0xff]  ;;  %vm261_vm1 = vcmask 261120  }
   0xe   :  { %v53_v13 = vld [vmem:[%s1210_s0 + $0x50] sm:$0xff]  ;;  %253 = vperm.xlu1 %914, %v239_v12   ;;  %v237_v15 = vld [vmem:[%s1214_s4] sm:$0xff]  ;;  %v52_v16 = vld [vmem:[%s1210_s0 + $0x48] sm:$0xff] }
   0xf   :  { %825 = vmatpush3.xpose.msk.msra.mxu0 %vm83_vm0, %v55_v7  ;;  %v370_v17 = vld [vmem:[%s1216_s6 + $0x18] sm:$0xff]  ;;  %v369_v18 = vld [vmem:[%s1216_s6 + $0x10] sm:$0xff]  ;;  %v51_v19 = vld [vmem:[%s1210_s0 + $0x40] sm:$0xff] }
  0x10   :  { %826 = vmatprep.subr.msk.mxu0 %vm83_vm0, %v54_v10  ;;  %v368_v20 = vld [vmem:[%s1216_s6 + $0x8] sm:$0xff]  ;;  %v367_v21 = vld [vmem:[%s1216_s6] sm:$0xff]  ;;  %v50_v22 = vld [vmem:[%s1210_s0 + $0x38] sm:$0xff] }
  0x11   :  { %248 = vperm.xlu0 %913, %v238_v14   ;;  %v499_v23 = vld [vmem:[%s1218_s8 + $0x18] sm:$0xff]  ;;  %v498_v24 = vld [vmem:[%s1218_s8 + $0x10] sm:$0xff]  ;;  %v497_v26 = vld [vmem:[%s1218_s8 + $0x8] sm:$0xff] }
  0x12   :  { %243 = vperm.xlu1 %914, %v237_v15   ;;  %v49_v25 = vld [vmem:[%s1210_s0 + $0x30] sm:$0xff]  ;;  %v496_v27 = vld [vmem:[%s1218_s8] sm:$0xff]  ;;  %v48_v28 = vld [vmem:[%s1210_s0 + $0x28] sm:$0xff] }
  0x13   :  { %827 = vmatpush3.xpose.msk.msra.mxu0 %vm83_vm0, %v54_v10  ;;  %v623_v29 = vld [vmem:[%s1220_s10] sm:$0xff]  ;;  %v624_v30 = vld [vmem:[%s1220_s10 + $0x8] sm:$0x7f]  ;;  %v46_v32 = vld [vmem:[%s1210_s0 + $0x18] sm:$0xff] }
  0x14   :  { %828 = vmatprep.subr.msk.mxu0 %vm83_vm0, %v53_v13  ;;  %v47_v31 = vld [vmem:[%s1210_s0 + $0x20] sm:$0xff]  ;;  %v45_v33 = vld [vmem:[%s1210_s0 + $0x10] sm:$0xff]  ;;  %v44_v34 = vld [vmem:[%s1210_s0 + $0x8] sm:$0xff] }
  0x15   :  { %388 = vperm.xlu0 %913, %v370_v17   ;;  %v43_v35 = vld [vmem:[%s1210_s0] sm:$0xff]  ;;  %v40_v36 = vld [vmem:[%s1211_s1 + $0x8] sm:$0xff]  ;;  %v41_v37 = vld [vmem:[%s1211_s1 + $0x10] sm:$0xff]  ;;  %s938_s0 = smov [#allocation2]  }
  0x16   :  { %383 = vperm.xlu1 %914, %v369_v18   ;;  %v42_v38 = vld [vmem:[%s1211_s1 + $0x18] sm:$0xff]  ;;  %v233_v39 = vld [vmem:[%s1213_s3] sm:$0xff]  ;;  %v234_v56 = vld [vmem:[%s1213_s3 + $0x8] sm:$0xff]  ;;  %s723_s26 = sshll.u32 %s938_s0, 4  ;;  %s724_s26 = int_to_ptr.vmem [resolvable:$true] %s723_s26 }
  0x17   :  { %829 = vmatpush3.xpose.msk.msra.mxu0 %vm83_vm0, %v53_v13  ;;  %864 = vmatprep.mubr.msk.f32.mxu1 %vm261_vm1, %v233_v39  ;;  %v235_v57 = vld [vmem:[%s1213_s3 + $0x10] sm:$0xff]  ;;  %v236_v58 = vld [vmem:[%s1213_s3 + $0x18] sm:$0xff]  ;;  %v363_v59 = vld [vmem:[%s1215_s5] sm:$0xff]  ;;  %s915_s27 = scalar_lea.vmem %s724_s26, 256  ;;  %p920_p1 = scmp.lt.s32.totalorder %s724_s26, %s724_s26 }
  0x18   :  { %830 = vmatprep.subr.msk.mxu0 %vm83_vm0, %v52_v16  ;;  %v364_v12 = vld [vmem:[%s1215_s5 + $0x8] sm:$0xff]  ;;  %v365_v13 = vld [vmem:[%s1215_s5 + $0x10] sm:$0xff]  ;;  %v366_v14 = vld [vmem:[%s1215_s5 + $0x18] sm:$0xff]  ;;  %p916_p0 = scmp.ne.s32.totalorder %s724_s26, %s915_s27  ;;  %p921_p2 = scmp.lt.s32.totalorder %s915_s27, %s915_s27 }
  0x19   :  { %378 = vperm.xlu0 %913, %v368_v20   ;;  %v492_v15 = vld [vmem:[%s1217_s7] sm:$0xff] }
  0x1a   :  { %373 = vperm.xlu1 %914, %v367_v21   ;;  %p922_p3 = por %p921_p2, %p920_p1 }
  0x1b   :  { %831 = vmatpush3.xpose.msk.msra.mxu0 %vm83_vm0, %v52_v16 }
  0x1c   :  { %832 = vmatprep.subr.msk.mxu0 %vm83_vm0, %v51_v19  ;;  %p923_p4 = pnand %p922_p3, %p916_p0 }
  0x1d   :  { %517 = vperm.xlu0 %913, %v499_v23  }
  0x1e   :  { %512 = vperm.xlu1 %914, %v498_v24  }
  0x1f   :  { %833 = vmatpush3.xpose.msk.msra.mxu0 %vm83_vm0, %v51_v19 }
  0x20   :  { %834 = vmatprep.subr.msk.mxu0 %vm83_vm0, %v50_v22 }
  0x21   :  { %507 = vperm.xlu0 %913, %v497_v26  }
  0x22   :  { %502 = vperm.xlu1 %914, %v496_v27  }
  0x23   :  { %835 = vmatpush3.xpose.msk.msra.mxu0 %vm83_vm0, %v50_v22 }
  0x24   :  { %836 = vmatprep.subr.msk.mxu0 %vm83_vm0, %v49_v25 }
  0x25   :  { %627 = vperm.xlu0 %913, %v623_v29  }
  0x26   :  { %632 = vperm.xlu1 %914, %v624_v30  }
  0x27   :  { %837 = vmatpush3.xpose.msk.msra.mxu0 %vm83_vm0, %v49_v25 }
  0x28   :  { %838 = vmatprep.subr.msk.mxu0 %vm83_vm0, %v48_v28 }
  0x2b   :  { %839 = vmatpush3.xpose.msk.msra.mxu0 %vm83_vm0, %v48_v28 }
  0x2c   :  { %840 = vmatprep.subr.msk.mxu0 %vm83_vm0, %v47_v31 }
  0x2f   :  { %841 = vmatpush3.xpose.msk.msra.mxu0 %vm83_vm0, %v47_v31 }
  0x30   :  { %842 = vmatprep.subr.msk.mxu0 %vm83_vm0, %v46_v32 }
  0x33   :  { %843 = vmatpush3.xpose.msk.msra.mxu0 %vm83_vm0, %v46_v32  ;;  %v493_v32 = vld [vmem:[%s1217_s7 + $0x8] sm:$0xff] }
  0x34   :  { %844 = vmatprep.subr.msk.mxu0 %vm83_vm0, %v45_v33 }
  0x37   :  { %845 = vmatpush3.xpose.msk.msra.mxu0 %vm83_vm0, %v45_v33  ;;  %v494_v33 = vld [vmem:[%s1217_s7 + $0x10] sm:$0xff] }
  0x38   :  { %846 = vmatprep.subr.msk.mxu0 %vm83_vm0, %v44_v34 }
  0x3b   :  { %847 = vmatpush3.xpose.msk.msra.mxu0 %vm83_vm0, %v44_v34  ;;  %v495_v34 = vld [vmem:[%s1217_s7 + $0x18] sm:$0xff] }
  0x3c   :  { %848 = vmatprep.subr.msk.mxu0 %vm83_vm0, %v43_v35 }
  0x3f   :  { %849 = vmatpush3.xpose.msk.msra.mxu0 %vm83_vm0, %v43_v35  ;;  %v621_v35 = vld [vmem:[%s1219_s9] sm:$0xff] }
  0x42   :  { %851 = vmatmul.mubr.msk.f32.vlgmr.msra.gmra.mxu0 %vm83_vm0, %v40_v36 }
  0x43   :  { %853 = vmatprep.mubr.msk.f32.mxu0 %vm83_vm0, %v41_v37 }
  0x46   :  { %854 = vmatmul.mubr.msk.f32.gmra.mxu0 %vm83_vm0, %v42_v38 }
  0x7f   :  { %v81_v40 = vpop.permute.xlu0 %80 }
  0x80   :  { %v71_v42 = vpop.permute.xlu1 %70 }
  0x83   :  { %v76_v46 = vpop.permute.xlu0 %75 }
  0x84   :  { %v66_v51 = vpop.permute.xlu1 %65 }
  0x88   :  { %v259_v60 = vpop.permute.xlu0 %258 }
  0x89   :  { %v254_v62 = vpop.permute.xlu1 %253 }
  0x8c   :  { %v249_v2 = vpop.permute.xlu0 %248 }
  0x8d   :  { %v244_v7 = vpop.permute.xlu1 %243 }
  0x90   :  { %v389_v16 = vpop.permute.xlu0 %388 }
  0x91   :  { %v384_v18 = vpop.permute.xlu1 %383 }
  0x94   :  { %v379_v22 = vpop.permute.xlu0 %378 }
  0x95   :  { %v374_v27 = vpop.permute.xlu1 %373 }
  0x98   :  { %v518_v36 = vpop.permute.xlu0 %517 }
  0x99   :  { %v513_v38 = vpop.permute.xlu1 %512 }
 0x102   :  { %v852_v41 = vpop.f32.mrf.mxu0 }
 0x103   :  { %v216_v48 = vadd.f32 %v852_v41, %v71_v42  ;;  %v508_v42 = vpop.permute.xlu0 %507 }
 0x104   :  { %v210_v43 = vpop.f32.mrf.mxu0 }
 0x105   :  { %v211_v52 = vadd.f32 %v210_v43, %v66_v51  ;;  %v230_v54 = vmax.f32 %v216_v48, 0.0 }
 0x106   :  { %v855_v44 = vpop.f32.mrf.mxu0 }
 0x107   :  { %v226_v45 = vadd.f32 %v855_v44, %v81_v40  ;;  %v229_v55 = vmax.f32 %v211_v52, 0.0  ;;  %v622_v52 = vld [vmem:[%s1219_s9 + $0x8] sm:$0x7f] }
 0x108   :  { %v220_v47 = vpop.f32.mrf.mxu0 }
 0x109   :  { %v232_v49 = vmax.f32 %v226_v45, 0.0  ;;  %v221_v50 = vadd.f32 %v220_v47, %v76_v46  ;;  %v503_v47 = vpop.permute.xlu1 %502 }
 0x10b   :  { %v231_v53 = vmax.f32 %v221_v50, 0.0  ;;  %856 = vmatprep.subr.mxu1 %v232_v49 }
 0x10c   :  { %857 = vmatpush3.msra.mxu1 %v232_v49 }
 0x10d   :  { %858 = vmatprep.subr.mxu1 %v231_v53 }
 0x10e   :  { %859 = vmatpush3.msra.mxu1 %v231_v53  ;;  %v633_v53 = vpop.permute.xlu1 %632 }
 0x10f   :  { %860 = vmatprep.subr.mxu1 %v230_v54 }
 0x110   :  { %861 = vmatpush3.msra.mxu1 %v230_v54 }
 0x111   :  { %862 = vmatprep.subr.mxu1 %v229_v55 }
 0x112   :  { %863 = vmatpush3.msra.mxu1 %v229_v55 }
 0x113   :  { %865 = vmatmul.mubr.msk.f32.vlgmr.msra.gmra.mxu1 %vm261_vm1, %v234_v56  ;;  %v628_v56 = vpop.permute.xlu0 %627 }
 0x114   :  { %867 = vmatprep.mubr.msk.f32.mxu1 %vm261_vm1, %v235_v57 }
 0x117   :  { %868 = vmatmul.mubr.msk.f32.gmra.mxu1 %vm261_vm1, %v236_v58 }
 0x118   :  { %878 = vmatprep.mubr.msk.f32.mxu1 %vm261_vm1, %v363_v59 }
 0x1d3   :  { %v866_v61 = vpop.f32.mrf.mxu1 }
 0x1d4   :  { %v346_v4 = vadd.f32 %v866_v61, %v249_v2 }
 0x1d5   :  { %v340_v63 = vpop.f32.mrf.mxu1 }
 0x1d6   :  { %v341_v8 = vadd.f32 %v340_v63, %v244_v7  ;;  %v360_v10 = vmax.f32 %v346_v4, 0.0 }
 0x1d7   :  { %v869_v0 = vpop.f32.mrf.mxu1 }
 0x1d8   :  { %v356_v1 = vadd.f32 %v869_v0, %v259_v60  ;;  %v359_v11 = vmax.f32 %v341_v8, 0.0 }
 0x1d9   :  { %v350_v3 = vpop.f32.mrf.mxu1 }
 0x1da   :  { %v362_v5 = vmax.f32 %v356_v1, 0.0  ;;  %v351_v6 = vadd.f32 %v350_v3, %v254_v62 }
 0x1dc   :  { %v361_v9 = vmax.f32 %v351_v6, 0.0  ;;  %870 = vmatprep.subr.mxu1 %v362_v5 }
 0x1dd   :  { %871 = vmatpush3.msra.mxu1 %v362_v5 }
 0x1de   :  { %872 = vmatprep.subr.mxu1 %v361_v9 }
 0x1df   :  { %873 = vmatpush3.msra.mxu1 %v361_v9 }
 0x1e0   :  { %874 = vmatprep.subr.mxu1 %v360_v10 }
 0x1e1   :  { %875 = vmatpush3.msra.mxu1 %v360_v10 }
 0x1e2   :  { %876 = vmatprep.subr.mxu1 %v359_v11 }
 0x1e3   :  { %877 = vmatpush3.msra.mxu1 %v359_v11 }
 0x1e4   :  { %879 = vmatmul.mubr.msk.f32.vlgmr.msra.gmra.mxu1 %vm261_vm1, %v364_v12 }
 0x1e5   :  { %881 = vmatprep.mubr.msk.f32.mxu1 %vm261_vm1, %v365_v13 }
 0x1e8   :  { %882 = vmatmul.mubr.msk.f32.gmra.mxu1 %vm261_vm1, %v366_v14 }
 0x1e9   :  { %892 = vmatprep.mubr.msk.f32.mxu1 %vm261_vm1, %v492_v15 }
 0x2a4   :  { %v880_v17 = vpop.f32.mrf.mxu1 }
 0x2a5   :  { %v475_v24 = vadd.f32 %v880_v17, %v379_v22 }
 0x2a6   :  { %v469_v19 = vpop.f32.mrf.mxu1 }
 0x2a7   :  { %v470_v28 = vadd.f32 %v469_v19, %v374_v27  ;;  %v489_v30 = vmax.f32 %v475_v24, 0.0 }
 0x2a8   :  { %v883_v20 = vpop.f32.mrf.mxu1 }
 0x2a9   :  { %v485_v21 = vadd.f32 %v883_v20, %v389_v16  ;;  %v488_v31 = vmax.f32 %v470_v28, 0.0 }
 0x2aa   :  { %v479_v23 = vpop.f32.mrf.mxu1 }
 0x2ab   :  { %v491_v25 = vmax.f32 %v485_v21, 0.0  ;;  %v480_v26 = vadd.f32 %v479_v23, %v384_v18 }
 0x2ad   :  { %v490_v29 = vmax.f32 %v480_v26, 0.0  ;;  %884 = vmatprep.subr.mxu1 %v491_v25 }
 0x2ae   :  { %885 = vmatpush3.msra.mxu1 %v491_v25 }
 0x2af   :  { %886 = vmatprep.subr.mxu1 %v490_v29 }
 0x2b0   :  { %887 = vmatpush3.msra.mxu1 %v490_v29 }
 0x2b1   :  { %888 = vmatprep.subr.mxu1 %v489_v30 }
 0x2b2   :  { %889 = vmatpush3.msra.mxu1 %v489_v30 }
 0x2b3   :  { %890 = vmatprep.subr.mxu1 %v488_v31 }
 0x2b4   :  { %891 = vmatpush3.msra.mxu1 %v488_v31 }
 0x2b5   :  { %893 = vmatmul.mubr.msk.f32.vlgmr.msra.gmra.mxu1 %vm261_vm1, %v493_v32 }
 0x2b6   :  { %895 = vmatprep.mubr.msk.f32.mxu1 %vm261_vm1, %v494_v33 }
 0x2b9   :  { %896 = vmatmul.mubr.msk.f32.gmra.mxu1 %vm261_vm1, %v495_v34 }
 0x2ba   :  { %906 = vmatprep.mubr.msk.f32.mxu1 %vm261_vm1, %v621_v35 }
 0x375   :  { %v894_v37 = vpop.f32.mrf.mxu1 }
 0x376   :  { %v604_v44 = vadd.f32 %v894_v37, %v508_v42 }
 0x377   :  { %v598_v39 = vpop.f32.mrf.mxu1 }
 0x378   :  { %v599_v48 = vadd.f32 %v598_v39, %v503_v47  ;;  %v618_v50 = vmax.f32 %v604_v44, 0.0 }
 0x379   :  { %v897_v40 = vpop.f32.mrf.mxu1 }
 0x37a   :  { %v614_v41 = vadd.f32 %v897_v40, %v518_v36  ;;  %v617_v51 = vmax.f32 %v599_v48, 0.0 }
 0x37b   :  { %v608_v43 = vpop.f32.mrf.mxu1 }
 0x37c   :  { %v620_v45 = vmax.f32 %v614_v41, 0.0  ;;  %v609_v46 = vadd.f32 %v608_v43, %v513_v38 }
 0x37e   :  { %v619_v49 = vmax.f32 %v609_v46, 0.0  ;;  %898 = vmatprep.subr.mxu1 %v620_v45 }
 0x37f   :  { %899 = vmatpush3.msra.mxu1 %v620_v45 }
 0x380   :  { %900 = vmatprep.subr.mxu1 %v619_v49 }
 0x381   :  { %901 = vmatpush3.msra.mxu1 %v619_v49 }
 0x382   :  { %902 = vmatprep.subr.mxu1 %v618_v50 }
 0x383   :  { %903 = vmatpush3.msra.mxu1 %v618_v50 }
 0x384   :  { %904 = vmatprep.subr.mxu1 %v617_v51 }
 0x385   :  { %905 = vmatpush3.msra.mxu1 %v617_v51 }
 0x386   :  { %907 = vmatmul.mubr.msk.f32.vlgmr.msra.gmra.mxu1 %vm261_vm1, %v622_v52 }
 0x446   :  { %v908_v54 = vpop.f32.mrf.mxu1 }
 0x447   :  { %v713_v55 = vadd.f32 %v908_v54, %v633_v53 }
 0x448   :  { %v707_v57 = vpop.f32.mrf.mxu1 }
 0x449   :  { %717 = vst [vmem:[#allocation2 + $0x8] sm:$0x7f] %v713_v55  ;;  %v708_v58 = vadd.f32 %v707_v57, %v628_v56 }
 0x44b   :  { %716 = vst [vmem:[#allocation2] sm:$0xff] %v708_v58 }
 0x44c   :  { %926 = shalt.err (!%p923_p4)
}
 0x44d   :  { %s939_s9 = smov 128   ;;  %s940_s1 = smov 8  }
 0x44e   :  { %729 = dma.vmem_to_hbm [thread:$0]  %s724_s26, 256, %s1221_s11, [#allocation3], %s939_s9, %s939_s9, %s940_s1  }
 0x44f   :  { %935 = dma.done.wait [#allocation3], 256  }
 0x450   :  { %936 = vsyncadd [#allocation3], 4294967040 }
 0x451   :  { %733 = vsyncpa [#allocation3], 1 }

</bundles_post_ra>
